<compile_context>
chip_gen: v7x
topology: tpu7x:2x2x1
jax: 0.10.0
libtpu: 0.0.40
codegen_flags: <defaults>
</compile_context>

<pallas_src>
import functools

import jax
import jax.numpy as jnp
import numpy as np
from jax.experimental import pallas as pl
from jax.experimental.pallas import tpu as pltpu


def make_kernel(k):
    """Same semantics as the PyTorch make_kernel (numpy, deterministic)."""
    k = np.asarray(k, dtype=np.float32)
    if k.ndim == 1:
        k = k[None, :] * k[:, None]
    k = k / k.sum()
    return k


def _cdiv(a, b):
    return -(-a // b)


def _rup(a, b):
    return _cdiv(a, b) * b


def _sublane_tile(itemsize):
    # second-minor tiling: 8 rows for 32-bit, 16 for 16-bit, 32 for 8-bit
    return 8 * max(1, 4 // max(1, itemsize))


# --------------------------- kernel bodies ----------------------------------
def _blur_body_3d(x_ref, o_ref, pad_ref, *, kv, kh_taps, kf, kh, kw,
                  h_pad, w_pad, h_out, w_out,
                  dr0, dc0, sr0, sc0, nrows, ncols, use_roll):
    """Wide-image path: blocks are (c_blk, H, W)."""
    cb = pad_ref.shape[0]
    sdt = pad_ref.dtype
    f32 = jnp.float32

    # Zero only the pad-border strips; the interior is fully overwritten by the
    # input copy below, so everything the taps read is initialized EVERY grid
    # step (no pl.when(program_id==0): on v7x 'parallel' core 1 never runs it).
    if dr0 > 0:
        pad_ref[:, 0:dr0, :] = jnp.zeros((cb, dr0, w_pad), sdt)
    nbot = h_pad - (dr0 + nrows)
    if nbot > 0:
        pad_ref[:, dr0 + nrows:h_pad, :] = jnp.zeros((cb, nbot, w_pad), sdt)
    if dc0 > 0:
        pad_ref[:, dr0:dr0 + nrows, 0:dc0] = jnp.zeros((cb, nrows, dc0), sdt)
    nrt = w_pad - (dc0 + ncols)
    if nrt > 0:
        pad_ref[:, dr0:dr0 + nrows, dc0 + ncols:w_pad] = (
            jnp.zeros((cb, nrows, nrt), sdt))
    pad_ref[:, dr0:dr0 + nrows, dc0:dc0 + ncols] = (
        x_ref[:, sr0:sr0 + nrows, sc0:sc0 + ncols].astype(sdt))

    if kf is None:
        # Separable blur: vertical 1-D pass (sublane shifts) ...
        tmp = kv[0] * pad_ref[:, 0:h_out, :].astype(f32)
        for i in range(1, kh):
            tmp = tmp + kv[i] * pad_ref[:, i:i + h_out, :].astype(f32)
        # ... then horizontal 1-D pass (lane shifts / XLU roll).
        if use_roll:
            acc = kh_taps[0] * tmp
            for j in range(1, kw):
                acc = acc + kh_taps[j] * pltpu.roll(tmp, shift=w_pad - j, axis=2)
            o_ref[...] = acc[:, :, 0:w_out].astype(o_ref.dtype)
        else:
            acc = kh_taps[0] * tmp[:, :, 0:w_out]
            for j in range(1, kw):
                acc = acc + kh_taps[j] * tmp[:, :, j:j + w_out]
            o_ref[...] = acc.astype(o_ref.dtype)
    else:
        # Non-separable (explicit 2-D kernel argument): dense kh*kw taps.
        acc = None
        for i in range(kh):
            for j in range(kw):
                term = kf[i][j] * pad_ref[:, i:i + h_out, j:j + w_out].astype(f32)
                acc = term if acc is None else acc + term
        o_ref[...] = acc.astype(o_ref.dtype)


def _blur_body_flat(x_ref, o_ref, pad_ref, *, kv, kh_taps, kf, kh, kw,
                    w, w_pad, w_out, h_out,
                    dr0, dc0, sr0, sc0, nrows, ncols):
    """Narrow-image (w_pad < 128) lane-dense path: blocks are (c_blk, H*W)."""
    sdt = pad_ref.dtype
    f32 = jnp.float32

    # Dense flat scratch: a full zero is cheap here (no lane padding); zeroing
    # only the per-row pad gaps would cost MORE vst (they are lane-sparse).
    pad_ref[...] = jnp.zeros_like(pad_ref)
    # Re-pack stride-w input rows into the stride-w_pad padded frame.
    for r in range(nrows):
        src = (sr0 + r) * w + sc0
        dst = (dr0 + r) * w_pad + dc0
        pad_ref[:, dst:dst + ncols] = x_ref[:, src:src + ncols].astype(sdt)

    lv = h_out * w_pad          # vertical-pass length (flat, stride w_pad)
    lh = lv - kw + 1            # horizontal-pass length
    if kf is None:
        tmp = kv[0] * pad_ref[:, 0:lv].astype(f32)
        for i in range(1, kh):
            off = i * w_pad
            tmp = tmp + kv[i] * pad_ref[:, off:off + lv].astype(f32)
        acc = kh_taps[0] * tmp[:, 0:lh]
        for j in range(1, kw):
            acc = acc + kh_taps[j] * tmp[:, j:j + lh]
    else:
        acc = None
        for i in range(kh):
            for j in range(kw):
                off = i * w_pad + j
                term = kf[i][j] * pad_ref[:, off:off + lh].astype(f32)
                acc = term if acc is None else acc + term
    acc = acc.astype(o_ref.dtype)

    # Repack stride-w_pad rows into the dense stride-w_out output block so the
    # output VMEM buffer and its HBM DMA are lane-dense (no narrow strided DMA).
    for r in range(h_out):
        o_ref[:, r * w_out:(r + 1) * w_out] = acc[:, r * w_pad:r * w_pad + w_out]


# ------------------------------ wrapper --------------------------------------
def blur_pallas(x, blur_kernel, pad, upsample_factor=1):
    """Blur.forward: out = upfirdn2d(x, make_kernel(k) [* up**2], pad=pad)."""
    n, c, h, w = x.shape
    pad0, pad1 = pad
    k = np.asarray(blur_kernel, dtype=np.float32)

    if k.ndim == 1:
        # make_kernel(k) = outer(k, k) / sum(k)^2 -> exactly separable.
        s = float(k.sum())
        kr = k[::-1]                       # upfirdn2d flips -> true convolution
        kh = kw = int(k.shape[0])
        kv = [float(v) / s for v in kr]
        kh_taps = [float(v) / s * (upsample_factor ** 2) for v in kr]
        kf = None
    else:
        k2 = make_kernel(k)
        if upsample_factor > 1:
            k2 = k2 * (upsample_factor ** 2)
        kfv = k2[::-1, ::-1]
        kh, kw = kfv.shape
        kf = [[float(kfv[i, j]) for j in range(kw)] for i in range(kh)]
        kv = kh_taps = None

    h_pad = h + pad0 + pad1
    w_pad = w + pad0 + pad1
    h_out = h_pad - kh + 1
    w_out = w_pad - kw + 1
    assert h_out > 0 and w_out > 0, "degenerate output size"

    # Where the (possibly cropped) input lands inside the zero-padded frame;
    # reproduces upfirdn2d's pad-then-negative-crop semantics exactly.
    dr0, dc0 = max(pad0, 0), max(pad0, 0)
    sr0, sc0 = max(-pad0, 0), max(-pad0, 0)
    nrows = h - sr0 - max(-pad1, 0)
    ncols = w - sc0 - max(-pad1, 0)
    assert nrows > 0 and ncols > 0, "pad crops away the whole input"

    nc = n * c
    dsz = jnp.dtype(x.dtype).itemsize
    sdt = x.dtype if jnp.issubdtype(x.dtype, jnp.floating) else jnp.float32
    sdsz = jnp.dtype(sdt).itemsize

    # Lane-dense flat path for narrow images (masked vst + narrow strided DMAs
    # are the dominant cost when W < 128); bounded unroll of the per-row loops.
    use_flat = (w_pad < 128 and h_pad <= 192 and h_out <= 192
                and dsz in (1, 2, 4) and sdsz in (2, 4))

    # ---- VMEM accounting (includes (8,128) lane/sublane padding) ------------
    if use_flat:
        vm_in = _rup(h * w, 128) * dsz
        vm_out = _rup(h_out * w_out, 128) * dsz
        vm_scr = _rup(h_pad * w_pad, 128) * sdsz
        vm_tmp = 3 * _rup(h_out * w_pad, 128) * 4
    else:
        vm_in = _rup(h, _sublane_tile(dsz)) * _rup(w, 128) * dsz
        vm_out = _rup(h_out, _sublane_tile(dsz)) * _rup(w_out, 128) * dsz
        vm_scr = _rup(h_pad, _sublane_tile(sdsz)) * _rup(w_pad, 128) * sdsz
        vm_tmp = 3 * _rup(h_out, 8) * _rup(w_pad, 128) * 4
    per_chan = 2 * vm_in + 2 * vm_out + vm_scr + vm_tmp

    try:
        vmem_cap = int(pltpu.get_tpu_info().vmem_capacity_bytes)
    except Exception:
        vmem_cap = 64 * 1024 * 1024        # conservative (v7x per-TC VMEM)
    budget = max(8 << 20, (vmem_cap * 3) // 8)          # ~37.5% of VMEM
    vmem_limit = max(32 << 20, min((vmem_cap * 3) // 4, 128 << 20))

    # ---- channel blocking ----------------------------------------------------
    c_max_vmem = max(1, budget // per_chan)
    c_from_steps = _cdiv(nc, 8)                          # >= ~8 steps (4/TC v7x)
    c_from_bytes = max(1, (256 * 1024) // max(1, h * w * dsz))  # >=256KiB DMAs
    c_blk = max(1, min(nc, max(c_from_steps, c_from_bytes), c_max_vmem))
    if use_flat and c_blk != nc:
        # Flat blocks put c_blk in the second-minor dim -> must be a multiple
        # of the sublane tile (or equal to the full dim).
        sub = _sublane_tile(dsz)
        cand = max(sub, (c_blk // sub) * sub)
        c_blk = cand if cand <= nc else nc
    grid = (_cdiv(nc, c_blk),)      # ragged last block is fine: channels indep.

    # ---- build the pallas_call ----------------------------------------------
    if use_flat:
        xf = x.reshape(nc, h * w)                       # contiguous: free
        body = functools.partial(
            _blur_body_flat, kv=kv, kh_taps=kh_taps, kf=kf, kh=kh, kw=kw,
            w=w, w_pad=w_pad, w_out=w_out, h_out=h_out,
            dr0=dr0, dc0=dc0, sr0=sr0, sc0=sc0, nrows=nrows, ncols=ncols)
        in_specs = [pl.BlockSpec((c_blk, h * w), lambda i: (i, 0))]
        out_specs = pl.BlockSpec((c_blk, h_out * w_out), lambda i: (i, 0))
        out_shape = jax.ShapeDtypeStruct((nc, h_out * w_out), x.dtype)
        scratch = [pltpu.VMEM((c_blk, h_pad * w_pad), sdt)]
    else:
        xf = x.reshape(nc, h, w)                        # contiguous: free
        body = functools.partial(
            _blur_body_3d, kv=kv, kh_taps=kh_taps, kf=kf, kh=kh, kw=kw,
            h_pad=h_pad, w_pad=w_pad, h_out=h_out, w_out=w_out,
            dr0=dr0, dc0=dc0, sr0=sr0, sc0=sc0, nrows=nrows, ncols=ncols,
            use_roll=(w_pad % 128 == 0))
        in_specs = [pl.BlockSpec((c_blk, h, w), lambda i: (i, 0, 0))]
        out_specs = pl.BlockSpec((c_blk, h_out, w_out), lambda i: (i, 0, 0))
        out_shape = jax.ShapeDtypeStruct((nc, h_out, w_out), x.dtype)
        scratch = [pltpu.VMEM((c_blk, h_pad, w_pad), sdt)]

    taps = (kh + kw) if kf is None else (kh * kw)
    cost = pl.CostEstimate(
        flops=2 * taps * nc * h_out * w_out,
        transcendentals=0,
        bytes_accessed=nc * (h * w + h_out * w_out) * dsz)

    out = pl.pallas_call(
        body,
        out_shape=out_shape,
        grid_spec=pltpu.PrefetchScalarGridSpec(
            num_scalar_prefetch=0,
            grid=grid,
            in_specs=in_specs,
            out_specs=out_specs,
            scratch_shapes=scratch),
        compiler_params=pltpu.CompilerParams(
            dimension_semantics=("parallel",),
            vmem_limit_bytes=int(vmem_limit)),
        cost_estimate=cost,
    )(xf)
    return out.reshape(n, c, h_out, w_out)


# ----------------------------- reference -------------------------------------
def _pad_like_upfirdn(x, pad0, pad1):
    xp = jnp.pad(x, ((0, 0), (0, 0),
                     (max(pad0, 0), max(pad1, 0)),
                     (max(pad0, 0), max(pad1, 0))))
    hp, wp = xp.shape[2], xp.shape[3]
    return xp[:, :, max(-pad0, 0): hp - max(-pad1, 0),
              max(-pad0, 0): wp - max(-pad1, 0)]


def blur_reference(x, blur_kernel, pad, upsample_factor=1):
    """Pure-JAX reference (explicit padded conv, f32) for validation."""
    k2 = make_kernel(blur_kernel)
    if upsample_factor > 1:
        k2 = k2 * (upsample_factor ** 2)
    kh, kw = k2.shape
    kfv = k2[::-1, ::-1]
    xp = _pad_like_upfirdn(x.astype(jnp.float32), pad[0], pad[1])
    h_out = xp.shape[2] - kh + 1
    w_out = xp.shape[3] - kw + 1
    out = jnp.zeros(xp.shape[:2] + (h_out, w_out), jnp.float32)
    for i in range(kh):
        for j in range(kw):
            out = out + float(kfv[i, j]) * xp[:, :, i:i + h_out, j:j + w_out]
    return out.astype(x.dtype)


if __name__ == "__main__":
    blur_kernel_1d = [1, 3, 3, 1]
    pad = (2, 1)   # typical StyleGAN2 discriminator blur config

    # Case 1: narrow image -> lane-dense flat path.
    x1 = jax.random.normal(jax.random.PRNGKey(0), (2, 4, 16, 16),
                           dtype=jnp.float32)
    out1 = jax.block_until_ready(blur_pallas(x1, blur_kernel_1d, pad))
    ref1 = jax.block_until_ready(blur_reference(x1, blur_kernel_1d, pad))
    assert out1.shape == ref1.shape, (out1.shape, ref1.shape)
    np.testing.assert_allclose(np.asarray(out1), np.asarray(ref1),
                               rtol=1e-5, atol=1e-5)

    # Case 2: wide image -> 3-D blocked path.
    x2 = jax.random.normal(jax.random.PRNGKey(1), (1, 2, 8, 128),
                           dtype=jnp.float32)
    out2 = jax.block_until_ready(blur_pallas(x2, blur_kernel_1d, pad))
    ref2 = jax.block_until_ready(blur_reference(x2, blur_kernel_1d, pad))
    assert out2.shape == ref2.shape, (out2.shape, ref2.shape)
    np.testing.assert_allclose(np.asarray(out2), np.asarray(ref2),
                               rtol=1e-5, atol=1e-5)

    print("KERNEL_OK")
</pallas_src>

<mosaic_0001>
module attributes {stable_mosaic.version = 11 : i64} {
  func.func @_blur_body_flat(%arg0: i32, %arg1: memref<8x256xf32, #tpu.memory_space<vmem>>, %arg2: memref<8x256xf32, #tpu.memory_space<vmem>>, %arg3: memref<8x361xf32, #tpu.memory_space<vmem>>) attributes {dimension_semantics = [#tpu.dimension_semantics<parallel>], iteration_bounds = array<i64: 1>, scalar_prefetch = 0 : i64, scratch_operands = 1 : i64, tpu.core_type = #tpu.core_type<tc>, window_params = [{transform_indices = @transform_0, window_bounds = array<i64: 8, 256>}, {transform_indices = @transform_1, window_bounds = array<i64: 8, 256>}]} {
    %cst = arith.constant 0.000000e+00 : f32
    %0 = vector.broadcast %cst : f32 to vector<8x361xf32>
    %c0 = arith.constant 0 : index
    %c0_0 = arith.constant 0 : index
    %1 = vector.load %arg3[%c0, %c0_0] : memref<8x361xf32, #tpu.memory_space<vmem>>, vector<8x361xf32>
    tpu.vector_store %arg3[%c0, %c0_0], %0 {strides = array<i32>} : memref<8x361xf32, #tpu.memory_space<vmem>>, vector<8x361xf32>,
    %c0_1 = arith.constant 0 : index
    %c0_2 = arith.constant 0 : index
    %2 = vector.load %arg1[%c0_1, %c0_2] : memref<8x256xf32, #tpu.memory_space<vmem>>, vector<8x16xf32>
    %c0_3 = arith.constant 0 : index
    %c40 = arith.constant 40 : index
    %3 = vector.load %arg3[%c0_3, %c40] : memref<8x361xf32, #tpu.memory_space<vmem>>, vector<8x16xf32>
    tpu.vector_store %arg3[%c0_3, %c40], %2 {strides = array<i32>} : memref<8x361xf32, #tpu.memory_space<vmem>>, vector<8x16xf32>,
    %c0_4 = arith.constant 0 : index
    %c16 = arith.constant 16 : index
    %4 = vector.load %arg1[%c0_4, %c16] : memref<8x256xf32, #tpu.memory_space<vmem>>, vector<8x16xf32>
    %c0_5 = arith.constant 0 : index
    %c59 = arith.constant 59 : index
    %5 = vector.load %arg3[%c0_5, %c59] : memref<8x361xf32, #tpu.memory_space<vmem>>, vector<8x16xf32>
    tpu.vector_store %arg3[%c0_5, %c59], %4 {strides = array<i32>} : memref<8x361xf32, #tpu.memory_space<vmem>>, vector<8x16xf32>,
    %c0_6 = arith.constant 0 : index
    %c32 = arith.constant 32 : index
    %6 = vector.load %arg1[%c0_6, %c32] : memref<8x256xf32, #tpu.memory_space<vmem>>, vector<8x16xf32>
    %c0_7 = arith.constant 0 : index
    %c78 = arith.constant 78 : index
    %7 = vector.load %arg3[%c0_7, %c78] : memref<8x361xf32, #tpu.memory_space<vmem>>, vector<8x16xf32>
    tpu.vector_store %arg3[%c0_7, %c78], %6 {strides = array<i32>} : memref<8x361xf32, #tpu.memory_space<vmem>>, vector<8x16xf32>,
    %c0_8 = arith.constant 0 : index
    %c48 = arith.constant 48 : index
    %8 = vector.load %arg1[%c0_8, %c48] : memref<8x256xf32, #tpu.memory_space<vmem>>, vector<8x16xf32>
    %c0_9 = arith.constant 0 : index
    %c97 = arith.constant 97 : index
    %9 = vector.load %arg3[%c0_9, %c97] : memref<8x361xf32, #tpu.memory_space<vmem>>, vector<8x16xf32>
    tpu.vector_store %arg3[%c0_9, %c97], %8 {strides = array<i32>} : memref<8x361xf32, #tpu.memory_space<vmem>>, vector<8x16xf32>,
    %c0_10 = arith.constant 0 : index
    %c64 = arith.constant 64 : index
    %10 = vector.load %arg1[%c0_10, %c64] : memref<8x256xf32, #tpu.memory_space<vmem>>, vector<8x16xf32>
    %c0_11 = arith.constant 0 : index
    %c116 = arith.constant 116 : index
    %11 = vector.load %arg3[%c0_11, %c116] : memref<8x361xf32, #tpu.memory_space<vmem>>, vector<8x16xf32>
    tpu.vector_store %arg3[%c0_11, %c116], %10 {strides = array<i32>} : memref<8x361xf32, #tpu.memory_space<vmem>>, vector<8x16xf32>,
    %c0_12 = arith.constant 0 : index
    %c80 = arith.constant 80 : index
    %12 = vector.load %arg1[%c0_12, %c80] : memref<8x256xf32, #tpu.memory_space<vmem>>, vector<8x16xf32>
    %c0_13 = arith.constant 0 : index
    %c135 = arith.constant 135 : index
    %13 = vector.load %arg3[%c0_13, %c135] : memref<8x361xf32, #tpu.memory_space<vmem>>, vector<8x16xf32>
    tpu.vector_store %arg3[%c0_13, %c135], %12 {strides = array<i32>} : memref<8x361xf32, #tpu.memory_space<vmem>>, vector<8x16xf32>,
    %c0_14 = arith.constant 0 : index
    %c96 = arith.constant 96 : index
    %14 = vector.load %arg1[%c0_14, %c96] : memref<8x256xf32, #tpu.memory_space<vmem>>, vector<8x16xf32>
    %c0_15 = arith.constant 0 : index
    %c154 = arith.constant 154 : index
    %15 = vector.load %arg3[%c0_15, %c154] : memref<8x361xf32, #tpu.memory_space<vmem>>, vector<8x16xf32>
    tpu.vector_store %arg3[%c0_15, %c154], %14 {strides = array<i32>} : memref<8x361xf32, #tpu.memory_space<vmem>>, vector<8x16xf32>,
    %c0_16 = arith.constant 0 : index
    %c112 = arith.constant 112 : index
    %16 = vector.load %arg1[%c0_16, %c112] : memref<8x256xf32, #tpu.memory_space<vmem>>, vector<8x16xf32>
    %c0_17 = arith.constant 0 : index
    %c173 = arith.constant 173 : index
    %17 = vector.load %arg3[%c0_17, %c173] : memref<8x361xf32, #tpu.memory_space<vmem>>, vector<8x16xf32>
    tpu.vector_store %arg3[%c0_17, %c173], %16 {strides = array<i32>} : memref<8x361xf32, #tpu.memory_space<vmem>>, vector<8x16xf32>,
    %c0_18 = arith.constant 0 : index
    %c128 = arith.constant 128 : index
    %18 = vector.load %arg1[%c0_18, %c128] : memref<8x256xf32, #tpu.memory_space<vmem>>, vector<8x16xf32>
    %c0_19 = arith.constant 0 : index
    %c192 = arith.constant 192 : index
    %19 = vector.load %arg3[%c0_19, %c192] : memref<8x361xf32, #tpu.memory_space<vmem>>, vector<8x16xf32>
    tpu.vector_store %arg3[%c0_19, %c192], %18 {strides = array<i32>} : memref<8x361xf32, #tpu.memory_space<vmem>>, vector<8x16xf32>,
    %c0_20 = arith.constant 0 : index
    %c144 = arith.constant 144 : index
    %20 = vector.load %arg1[%c0_20, %c144] : memref<8x256xf32, #tpu.memory_space<vmem>>, vector<8x16xf32>
    %c0_21 = arith.constant 0 : index
    %c211 = arith.constant 211 : index
    %21 = vector.load %arg3[%c0_21, %c211] : memref<8x361xf32, #tpu.memory_space<vmem>>, vector<8x16xf32>
    tpu.vector_store %arg3[%c0_21, %c211], %20 {strides = array<i32>} : memref<8x361xf32, #tpu.memory_space<vmem>>, vector<8x16xf32>,
    %c0_22 = arith.constant 0 : index
    %c160 = arith.constant 160 : index
    %22 = vector.load %arg1[%c0_22, %c160] : memref<8x256xf32, #tpu.memory_space<vmem>>, vector<8x16xf32>
    %c0_23 = arith.constant 0 : index
    %c230 = arith.constant 230 : index
    %23 = vector.load %arg3[%c0_23, %c230] : memref<8x361xf32, #tpu.memory_space<vmem>>, vector<8x16xf32>
    tpu.vector_store %arg3[%c0_23, %c230], %22 {strides = array<i32>} : memref<8x361xf32, #tpu.memory_space<vmem>>, vector<8x16xf32>,
    %c0_24 = arith.constant 0 : index
    %c176 = arith.constant 176 : index
    %24 = vector.load %arg1[%c0_24, %c176] : memref<8x256xf32, #tpu.memory_space<vmem>>, vector<8x16xf32>
    %c0_25 = arith.constant 0 : index
    %c249 = arith.constant 249 : index
    %25 = vector.load %arg3[%c0_25, %c249] : memref<8x361xf32, #tpu.memory_space<vmem>>, vector<8x16xf32>
    tpu.vector_store %arg3[%c0_25, %c249], %24 {strides = array<i32>} : memref<8x361xf32, #tpu.memory_space<vmem>>, vector<8x16xf32>,
    %c0_26 = arith.constant 0 : index
    %c192_27 = arith.constant 192 : index
    %26 = vector.load %arg1[%c0_26, %c192_27] : memref<8x256xf32, #tpu.memory_space<vmem>>, vector<8x16xf32>
    %c0_28 = arith.constant 0 : index
    %c268 = arith.constant 268 : index
    %27 = vector.load %arg3[%c0_28, %c268] : memref<8x361xf32, #tpu.memory_space<vmem>>, vector<8x16xf32>
    tpu.vector_store %arg3[%c0_28, %c268], %26 {strides = array<i32>} : memref<8x361xf32, #tpu.memory_space<vmem>>, vector<8x16xf32>,
    %c0_29 = arith.constant 0 : index
    %c208 = arith.constant 208 : index
    %28 = vector.load %arg1[%c0_29, %c208] : memref<8x256xf32, #tpu.memory_space<vmem>>, vector<8x16xf32>
    %c0_30 = arith.constant 0 : index
    %c287 = arith.constant 287 : index
    %29 = vector.load %arg3[%c0_30, %c287] : memref<8x361xf32, #tpu.memory_space<vmem>>, vector<8x16xf32>
    tpu.vector_store %arg3[%c0_30, %c287], %28 {strides = array<i32>} : memref<8x361xf32, #tpu.memory_space<vmem>>, vector<8x16xf32>,
    %c0_31 = arith.constant 0 : index
    %c224 = arith.constant 224 : index
    %30 = vector.load %arg1[%c0_31, %c224] : memref<8x256xf32, #tpu.memory_space<vmem>>, vector<8x16xf32>
    %c0_32 = arith.constant 0 : index
    %c306 = arith.constant 306 : index
    %31 = vector.load %arg3[%c0_32, %c306] : memref<8x361xf32, #tpu.memory_space<vmem>>, vector<8x16xf32>
    tpu.vector_store %arg3[%c0_32, %c306], %30 {strides = array<i32>} : memref<8x361xf32, #tpu.memory_space<vmem>>, vector<8x16xf32>,
    %c0_33 = arith.constant 0 : index
    %c240 = arith.constant 240 : index
    %32 = vector.load %arg1[%c0_33, %c240] : memref<8x256xf32, #tpu.memory_space<vmem>>, vector<8x16xf32>
    %c0_34 = arith.constant 0 : index
    %c325 = arith.constant 325 : index
    %33 = vector.load %arg3[%c0_34, %c325] : memref<8x361xf32, #tpu.memory_space<vmem>>, vector<8x16xf32>
    tpu.vector_store %arg3[%c0_34, %c325], %32 {strides = array<i32>} : memref<8x361xf32, #tpu.memory_space<vmem>>, vector<8x16xf32>,
    %c0_35 = arith.constant 0 : index
    %c0_36 = arith.constant 0 : index
    %34 = vector.load %arg3[%c0_35, %c0_36] : memref<8x361xf32, #tpu.memory_space<vmem>>, vector<8x304xf32>
    %cst_37 = arith.constant 1.250000e-01 : f32
    %35 = vector.broadcast %cst_37 : f32 to vector<8x304xf32>
    %36 = arith.mulf %35, %34 : vector<8x304xf32>
    %c0_38 = arith.constant 0 : index
    %c19 = arith.constant 19 : index
    %37 = vector.load %arg3[%c0_38, %c19] : memref<8x361xf32, #tpu.memory_space<vmem>>, vector<8x304xf32>
    %cst_39 = arith.constant 3.750000e-01 : f32
    %38 = vector.broadcast %cst_39 : f32 to vector<8x304xf32>
    %39 = arith.mulf %38, %37 : vector<8x304xf32>
    %40 = arith.addf %36, %39 : vector<8x304xf32>
    %c0_40 = arith.constant 0 : index
    %c38 = arith.constant 38 : index
    %41 = vector.load %arg3[%c0_40, %c38] : memref<8x361xf32, #tpu.memory_space<vmem>>, vector<8x304xf32>
    %cst_41 = arith.constant 3.750000e-01 : f32
    %42 = vector.broadcast %cst_41 : f32 to vector<8x304xf32>
    %43 = arith.mulf %42, %41 : vector<8x304xf32>
    %44 = arith.addf %40, %43 : vector<8x304xf32>
    %c0_42 = arith.constant 0 : index
    %c57 = arith.constant 57 : index
    %45 = vector.load %arg3[%c0_42, %c57] : memref<8x361xf32, #tpu.memory_space<vmem>>, vector<8x304xf32>
    %cst_43 = arith.constant 1.250000e-01 : f32
    %46 = vector.broadcast %cst_43 : f32 to vector<8x304xf32>
    %47 = arith.mulf %46, %45 : vector<8x304xf32>
    %48 = arith.addf %44, %47 : vector<8x304xf32>
    %49 = vector.extract_strided_slice %48 {offsets = [0, 0], sizes = [8, 301], strides = [1, 1]} : vector<8x304xf32> to vector<8x301xf32>
    %cst_44 = arith.constant 1.250000e-01 : f32
    %50 = vector.broadcast %cst_44 : f32 to vector<8x301xf32>
    %51 = arith.mulf %50, %49 : vector<8x301xf32>
    %52 = vector.extract_strided_slice %48 {offsets = [0, 1], sizes = [8, 301], strides = [1, 1]} : vector<8x304xf32> to vector<8x301xf32>
    %cst_45 = arith.constant 3.750000e-01 : f32
    %53 = vector.broadcast %cst_45 : f32 to vector<8x301xf32>
    %54 = arith.mulf %53, %52 : vector<8x301xf32>
    %55 = arith.addf %51, %54 : vector<8x301xf32>
    %56 = vector.extract_strided_slice %48 {offsets = [0, 2], sizes = [8, 301], strides = [1, 1]} : vector<8x304xf32> to vector<8x301xf32>
    %cst_46 = arith.constant 3.750000e-01 : f32
    %57 = vector.broadcast %cst_46 : f32 to vector<8x301xf32>
    %58 = arith.mulf %57, %56 : vector<8x301xf32>
    %59 = arith.addf %55, %58 : vector<8x301xf32>
    %60 = vector.extract_strided_slice %48 {offsets = [0, 3], sizes = [8, 301], strides = [1, 1]} : vector<8x304xf32> to vector<8x301xf32>
    %cst_47 = arith.constant 1.250000e-01 : f32
    %61 = vector.broadcast %cst_47 : f32 to vector<8x301xf32>
    %62 = arith.mulf %61, %60 : vector<8x301xf32>
    %63 = arith.addf %59, %62 : vector<8x301xf32>
    %64 = vector.extract_strided_slice %63 {offsets = [0, 0], sizes = [8, 16], strides = [1, 1]} : vector<8x301xf32> to vector<8x16xf32>
    %c0_48 = arith.constant 0 : index
    %c0_49 = arith.constant 0 : index
    %65 = vector.load %arg2[%c0_48, %c0_49] : memref<8x256xf32, #tpu.memory_space<vmem>>, vector<8x16xf32>
    tpu.vector_store %arg2[%c0_48, %c0_49], %64 {strides = array<i32>} : memref<8x256xf32, #tpu.memory_space<vmem>>, vector<8x16xf32>,
    %66 = vector.extract_strided_slice %63 {offsets = [0, 19], sizes = [8, 16], strides = [1, 1]} : vector<8x301xf32> to vector<8x16xf32>
    %c0_50 = arith.constant 0 : index
    %c16_51 = arith.constant 16 : index
    %67 = vector.load %arg2[%c0_50, %c16_51] : memref<8x256xf32, #tpu.memory_space<vmem>>, vector<8x16xf32>
    tpu.vector_store %arg2[%c0_50, %c16_51], %66 {strides = array<i32>} : memref<8x256xf32, #tpu.memory_space<vmem>>, vector<8x16xf32>,
    %68 = vector.extract_strided_slice %63 {offsets = [0, 38], sizes = [8, 16], strides = [1, 1]} : vector<8x301xf32> to vector<8x16xf32>
    %c0_52 = arith.constant 0 : index
    %c32_53 = arith.constant 32 : index
    %69 = vector.load %arg2[%c0_52, %c32_53] : memref<8x256xf32, #tpu.memory_space<vmem>>, vector<8x16xf32>
    tpu.vector_store %arg2[%c0_52, %c32_53], %68 {strides = array<i32>} : memref<8x256xf32, #tpu.memory_space<vmem>>, vector<8x16xf32>,
    %70 = vector.extract_strided_slice %63 {offsets = [0, 57], sizes = [8, 16], strides = [1, 1]} : vector<8x301xf32> to vector<8x16xf32>
    %c0_54 = arith.constant 0 : index
    %c48_55 = arith.constant 48 : index
    %71 = vector.load %arg2[%c0_54, %c48_55] : memref<8x256xf32, #tpu.memory_space<vmem>>, vector<8x16xf32>
    tpu.vector_store %arg2[%c0_54, %c48_55], %70 {strides = array<i32>} : memref<8x256xf32, #tpu.memory_space<vmem>>, vector<8x16xf32>,
    %72 = vector.extract_strided_slice %63 {offsets = [0, 76], sizes = [8, 16], strides = [1, 1]} : vector<8x301xf32> to vector<8x16xf32>
    %c0_56 = arith.constant 0 : index
    %c64_57 = arith.constant 64 : index
    %73 = vector.load %arg2[%c0_56, %c64_57] : memref<8x256xf32, #tpu.memory_space<vmem>>, vector<8x16xf32>
    tpu.vector_store %arg2[%c0_56, %c64_57], %72 {strides = array<i32>} : memref<8x256xf32, #tpu.memory_space<vmem>>, vector<8x16xf32>,
    %74 = vector.extract_strided_slice %63 {offsets = [0, 95], sizes = [8, 16], strides = [1, 1]} : vector<8x301xf32> to vector<8x16xf32>
    %c0_58 = arith.constant 0 : index
    %c80_59 = arith.constant 80 : index
    %75 = vector.load %arg2[%c0_58, %c80_59] : memref<8x256xf32, #tpu.memory_space<vmem>>, vector<8x16xf32>
    tpu.vector_store %arg2[%c0_58, %c80_59], %74 {strides = array<i32>} : memref<8x256xf32, #tpu.memory_space<vmem>>, vector<8x16xf32>,
    %76 = vector.extract_strided_slice %63 {offsets = [0, 114], sizes = [8, 16], strides = [1, 1]} : vector<8x301xf32> to vector<8x16xf32>
    %c0_60 = arith.constant 0 : index
    %c96_61 = arith.constant 96 : index
    %77 = vector.load %arg2[%c0_60, %c96_61] : memref<8x256xf32, #tpu.memory_space<vmem>>, vector<8x16xf32>
    tpu.vector_store %arg2[%c0_60, %c96_61], %76 {strides = array<i32>} : memref<8x256xf32, #tpu.memory_space<vmem>>, vector<8x16xf32>,
    %78 = vector.extract_strided_slice %63 {offsets = [0, 133], sizes = [8, 16], strides = [1, 1]} : vector<8x301xf32> to vector<8x16xf32>
    %c0_62 = arith.constant 0 : index
    %c112_63 = arith.constant 112 : index
    %79 = vector.load %arg2[%c0_62, %c112_63] : memref<8x256xf32, #tpu.memory_space<vmem>>, vector<8x16xf32>
    tpu.vector_store %arg2[%c0_62, %c112_63], %78 {strides = array<i32>} : memref<8x256xf32, #tpu.memory_space<vmem>>, vector<8x16xf32>,
    %80 = vector.extract_strided_slice %63 {offsets = [0, 152], sizes = [8, 16], strides = [1, 1]} : vector<8x301xf32> to vector<8x16xf32>
    %c0_64 = arith.constant 0 : index
    %c128_65 = arith.constant 128 : index
    %81 = vector.load %arg2[%c0_64, %c128_65] : memref<8x256xf32, #tpu.memory_space<vmem>>, vector<8x16xf32>
    tpu.vector_store %arg2[%c0_64, %c128_65], %80 {strides = array<i32>} : memref<8x256xf32, #tpu.memory_space<vmem>>, vector<8x16xf32>,
    %82 = vector.extract_strided_slice %63 {offsets = [0, 171], sizes = [8, 16], strides = [1, 1]} : vector<8x301xf32> to vector<8x16xf32>
    %c0_66 = arith.constant 0 : index
    %c144_67 = arith.constant 144 : index
    %83 = vector.load %arg2[%c0_66, %c144_67] : memref<8x256xf32, #tpu.memory_space<vmem>>, vector<8x16xf32>
    tpu.vector_store %arg2[%c0_66, %c144_67], %82 {strides = array<i32>} : memref<8x256xf32, #tpu.memory_space<vmem>>, vector<8x16xf32>,
    %84 = vector.extract_strided_slice %63 {offsets = [0, 190], sizes = [8, 16], strides = [1, 1]} : vector<8x301xf32> to vector<8x16xf32>
    %c0_68 = arith.constant 0 : index
    %c160_69 = arith.constant 160 : index
    %85 = vector.load %arg2[%c0_68, %c160_69] : memref<8x256xf32, #tpu.memory_space<vmem>>, vector<8x16xf32>
    tpu.vector_store %arg2[%c0_68, %c160_69], %84 {strides = array<i32>} : memref<8x256xf32, #tpu.memory_space<vmem>>, vector<8x16xf32>,
    %86 = vector.extract_strided_slice %63 {offsets = [0, 209], sizes = [8, 16], strides = [1, 1]} : vector<8x301xf32> to vector<8x16xf32>
    %c0_70 = arith.constant 0 : index
    %c176_71 = arith.constant 176 : index
    %87 = vector.load %arg2[%c0_70, %c176_71] : memref<8x256xf32, #tpu.memory_space<vmem>>, vector<8x16xf32>
    tpu.vector_store %arg2[%c0_70, %c176_71], %86 {strides = array<i32>} : memref<8x256xf32, #tpu.memory_space<vmem>>, vector<8x16xf32>,
    %88 = vector.extract_strided_slice %63 {offsets = [0, 228], sizes = [8, 16], strides = [1, 1]} : vector<8x301xf32> to vector<8x16xf32>
    %c0_72 = arith.constant 0 : index
    %c192_73 = arith.constant 192 : index
    %89 = vector.load %arg2[%c0_72, %c192_73] : memref<8x256xf32, #tpu.memory_space<vmem>>, vector<8x16xf32>
    tpu.vector_store %arg2[%c0_72, %c192_73], %88 {strides = array<i32>} : memref<8x256xf32, #tpu.memory_space<vmem>>, vector<8x16xf32>,
    %90 = vector.extract_strided_slice %63 {offsets = [0, 247], sizes = [8, 16], strides = [1, 1]} : vector<8x301xf32> to vector<8x16xf32>
    %c0_74 = arith.constant 0 : index
    %c208_75 = arith.constant 208 : index
    %91 = vector.load %arg2[%c0_74, %c208_75] : memref<8x256xf32, #tpu.memory_space<vmem>>, vector<8x16xf32>
    tpu.vector_store %arg2[%c0_74, %c208_75], %90 {strides = array<i32>} : memref<8x256xf32, #tpu.memory_space<vmem>>, vector<8x16xf32>,
    %92 = vector.extract_strided_slice %63 {offsets = [0, 266], sizes = [8, 16], strides = [1, 1]} : vector<8x301xf32> to vector<8x16xf32>
    %c0_76 = arith.constant 0 : index
    %c224_77 = arith.constant 224 : index
    %93 = vector.load %arg2[%c0_76, %c224_77] : memref<8x256xf32, #tpu.memory_space<vmem>>, vector<8x16xf32>
    tpu.vector_store %arg2[%c0_76, %c224_77], %92 {strides = array<i32>} : memref<8x256xf32, #tpu.memory_space<vmem>>, vector<8x16xf32>,
    %94 = vector.extract_strided_slice %63 {offsets = [0, 285], sizes = [8, 16], strides = [1, 1]} : vector<8x301xf32> to vector<8x16xf32>
    %c0_78 = arith.constant 0 : index
    %c240_79 = arith.constant 240 : index
    %95 = vector.load %arg2[%c0_78, %c240_79] : memref<8x256xf32, #tpu.memory_space<vmem>>, vector<8x16xf32>
    tpu.vector_store %arg2[%c0_78, %c240_79], %94 {strides = array<i32>} : memref<8x256xf32, #tpu.memory_space<vmem>>, vector<8x16xf32>,
    return
  }
  func.func @transform_0(%arg0: i32) -> (i32, i32) {
    %c0_i32 = arith.constant 0 : i32
    %c0_i32_0 = arith.constant 0 : i32
    return %arg0, %c0_i32 : i32, i32
  }
  func.func @transform_1(%arg0: i32) -> (i32, i32) {
    %c0_i32 = arith.constant 0 : i32
    %c0_i32_0 = arith.constant 0 : i32
    return %arg0, %c0_i32 : i32, i32
  }
}

</mosaic_0001>

<bundles_post_ra>
// kernel: tpu_custom_call.1
= control target key start
LH: loop header
LB: loop body
LE: loop exit
PB: predicated region body
PF: predicated region fallthrough
CT: control target
= control target key end

     0   :  { %6 = vsyncpa [#allocation4], 0  ;;  %s525_s0 = inlined_call_operand.hbm [shape: f32[8,256], index: 0, kind: input, shape index: {}]   ;;  %s526_s1 = inlined_call_operand.hbm [shape: f32[8,256], index: 1, kind: output, shape index: {}]  }
   0x1   :  { %7 = vsyncpa [#allocation5], 0  ;;  %s439_s6 = smov [#allocation3]   ;;  %s391_s10 = scalar_lea.hbm %s525_s0, 256 }
   0x2   :  { %s14_s7 = sshll.u32 %s439_s6, 4  ;;  %p392_p0 = scmp.ne.s32.totalorder %s525_s0, %s391_s10  ;;  %s15_s7 = int_to_ptr.vmem [resolvable:$true] %s14_s7 }
   0x3   :  { %p395_p1 = scmp.lt.u32.totalorder %s391_s10, %s525_s0 }
   0x5   :  { %p397_p2 = pnand %p395_p1, %p392_p0 }
   0x7   :  { %400 = shalt.err (!%p397_p2)
}
   0x8   :  { %s401_s15 = scalar_lea.vmem %s15_s7, 256  ;;  %p406_p4 = scmp.lt.s32.totalorder %s15_s7, %s15_s7 }
   0x9   :  { %p402_p3 = scmp.ne.s32.totalorder %s15_s7, %s401_s15  ;;  %p407_p5 = scmp.lt.s32.totalorder %s401_s15, %s401_s15 }
   0xb   :  { %p408_p6 = por %p407_p5, %p406_p4 }
   0xd   :  { %p409_p7 = pnand %p408_p6, %p402_p3 }
   0xf   :  { %412 = shalt.err (!%p409_p7)
}
  0x10   :  { %17 = dma.hbm_to_vmem [thread:$0]  %s525_s0, 256, %s15_s7, [#allocation4]  }
  0x11   :  { %435 = dma.done.wait [#allocation4], 256  }
  0x12   :  { %436 = vsyncadd [#allocation4], 4294967040  ;;  %v440_v0 = vmov 0.0   ;;  %vm23_vm0 = vcmask 859136   ;;  %v69_v1 = vld [vmem:[#allocation3] sm:$0xff]  ;;  %s441_s18 = smov 58  }
  0x13   :  { %22 = vst [vmem:[#allocation2 + $0x8] sm:$0xff] %v440_v0  ;;  %21 = vst [vmem:[#allocation2] sm:$0xff] %v440_v0  ;;  %71 = vrot.lane.b32.xlu1 %v69_v1, %s441_s18  ;;  %s442_s19 = smov 52   ;;  %s443_s20 = smov 61   ;;  %v104_v2 = vld [vmem:[#allocation3 + $0x8] sm:$0xff]  ;;  %vm60_vm1 = vcmask 31744  }
  0x14   :  { %24 = vst.msk [vmem:[#allocation2 + $0x10] sm:$0xff] %vm23_vm0, %v440_v0  ;;  %55 = vrot.lane.b32.xlu0 %v69_v1, %s442_s19  ;;  %s444_s21 = smov 55   ;;  %s445_s22 = smov 73   ;;  %vm67_vm2 = vcmask 187448   ;;  %vm74_vm3 = vcmask 343248   ;;  %vm81_vm4 = vcmask 499048  }
  0x15   :  { %s446_s0 = smov 40   ;;  %s447_s23 = smov 64   ;;  %vm111_vm5 = vcmask 72704   ;;  %vm30_vm6 = vcmask 458048   ;;  %vm88_vm7 = vcmask 654848   ;;  %vm118_vm8 = vcmask 228448  }
  0x16   :  { %s448_s24 = smov 76   ;;  %s449_s25 = smov 43   ;;  %vm37_vm9 = vcmask 613848   ;;  %vm95_vm10 = vcmask 810648   ;;  %vm125_vm11 = vcmask 384248   ;;  %vm44_vm12 = vcmask 769648  }
  0x17   :  { %78 = vrot.lane.b32.xlu1 %v69_v1, %s443_s20  ;;  %s450_s26 = smov 67   ;;  %s451_s27 = smov 79   ;;  %vm102_vm13 = vcmask 966448   ;;  %vm132_vm14 = vcmask 540048   ;;  %vm109_vm15 = vcmask 1048520   ;;  %vm51_vm0 = vcmask 925448  }
  0x18   :  { %64 = vrot.lane.b32.xlu0 %v69_v1, %s444_s21  ;;  %s452_s28 = smov 46   ;;  %s453_s29 = smov 70  }
  0x19   :  { %s454_s30 = smov 82   ;;  %s455_s2 = smov 49  }
  0x1a   :  { %s456_s3 = smov 85   ;;  %s457_s4 = smov 109  }
  0x1b   :  { %27 = vrot.lane.b32.xlu1 %v69_v1, %s446_s0  ;;  %s458_s5 = smov 90   ;;  %s459_s6 = smov 71  }
  0x1c   :  { %106 = vrot.lane.b32.xlu0 %v104_v2, %s445_s22  ;;  %s460_s7 = smov 126   ;;  %s461_s8 = smov 127  }
  0x1d   :  { %s462_s9 = smov 125   ;;  %s463_s10 = smov 89  }
  0x1e   :  { %s464_s11 = smov 86   ;;  %s465_s12 = smov 104  }
  0x1f   :  { %115 = vrot.lane.b32.xlu1 %v104_v2, %s448_s24  ;;  %s466_s13 = smov 122   ;;  %s467_s14 = smov 101  }
  0x20   :  { %85 = vrot.lane.b32.xlu0 %v104_v2, %s447_s23  ;;  %s468_s15 = smov 119   ;;  %s469_s16 = smov 98  }
  0x21   :  { %s470_s17 = smov 116   ;;  %s471_s18 = smov 95  }
  0x22   :  { %s472_s19 = smov 92   ;;  %s473_s20 = smov 113  }
  0x23   :  { %92 = vrot.lane.b32.xlu1 %v104_v2, %s450_s26  ;;  %s474_s21 = smov 110   ;;  %s475_s22 = smov 83  }
  0x24   :  { %34 = vrot.lane.b32.xlu0 %v69_v1, %s449_s25  ;;  %s476_s0 = smov 107   ;;  %s477_s23 = smov [#allocation6]  }
  0x25   :  { %s343_s24 = sshll.u32 %s477_s23, 4  ;;  %s344_s24 = int_to_ptr.vmem [resolvable:$true] %s343_s24 }
  0x26   :  { %s413_s25 = scalar_lea.vmem %s344_s24, 256  ;;  %p418_p9 = scmp.lt.s32.totalorder %s344_s24, %s344_s24 }
  0x27   :  { %41 = vrot.lane.b32.xlu1 %v69_v1, %s452_s28  ;;  %p414_p8 = scmp.ne.s32.totalorder %s344_s24, %s413_s25  ;;  %p419_p10 = scmp.lt.s32.totalorder %s413_s25, %s413_s25 }
  0x28   :  { %122 = vrot.lane.b32.xlu0 %v104_v2, %s451_s27 }
  0x29   :  { %p420_p11 = por %p419_p10, %p418_p9 }
  0x2b   :  { %129 = vrot.lane.b32.xlu1 %v104_v2, %s454_s30  ;;  %p421_p12 = pnand %p420_p11, %p414_p8 }
  0x2c   :  { %99 = vrot.lane.b32.xlu0 %v104_v2, %s453_s29 }
  0x2f   :  { %136 = vrot.lane.b32.xlu1 %v104_v2, %s456_s3 }
  0x30   :  { %48 = vrot.lane.b32.xlu0 %v69_v1, %s455_s2 }
  0x85   :  { %v72_v3 = vpop.permute.xlu1 %71 }
  0x86   :  { %v56_v4 = vpop.permute.xlu0 %55 }
  0x87   :  { %61 = vst.msk [vmem:[#allocation2 + $0x8] sm:$0xff] %vm60_vm1, %v56_v4  ;;  %vm139_vm1 = vcmask 695848  }
  0x89   :  { %v79_v5 = vpop.permute.xlu1 %78 }
  0x8a   :  { %v65_v6 = vpop.permute.xlu0 %64 }
  0x8b   :  { %68 = vst.msk [vmem:[#allocation2 + $0x8] sm:$0xff] %vm67_vm2, %v65_v6  ;;  %vm58_vm2 = vcmask 1048480  }
  0x8c   :  { %75 = vst.msk [vmem:[#allocation2 + $0x8] sm:$0xff] %vm74_vm3, %v72_v3  ;;  %vm159_vm3 = vcmask 891904  }
  0x8d   :  { %82 = vst.msk [vmem:[#allocation2 + $0x8] sm:$0xff] %vm81_vm4, %v79_v5  ;;  %v28_v8 = vpop.permute.xlu1 %27  ;;  %vm174_vm4 = vcmask 736256  }
  0x8e   :  { %v107_v7 = vpop.permute.xlu0 %106  ;;  %31 = vst.msk [vmem:[#allocation2] sm:$0xff] %vm30_vm6, %v28_v8  ;;  %vm216_vm6 = vcmask 1039360  }
  0x8f   :  { %112 = vst.msk [vmem:[#allocation2 + $0x10] sm:$0xff] %vm111_vm5, %v107_v7  ;;  %vm192_vm5 = vcmask 580608  }
  0x91   :  { %v116_v10 = vpop.permute.xlu1 %115 }
  0x92   :  { %v86_v9 = vpop.permute.xlu0 %85  ;;  %119 = vst.msk [vmem:[#allocation2 + $0x10] sm:$0xff] %vm118_vm8, %v116_v10  ;;  %vm231_vm8 = vcmask 1031168  }
  0x93   :  { %89 = vst.msk [vmem:[#allocation2 + $0x8] sm:$0xff] %vm88_vm7, %v86_v9 }
  0x95   :  { %v93_v12 = vpop.permute.xlu1 %92 }
  0x96   :  { %v35_v11 = vpop.permute.xlu0 %34  ;;  %96 = vst.msk [vmem:[#allocation2 + $0x8] sm:$0xff] %vm95_vm10, %v93_v12  ;;  %vm258_vm10 = vcmask 130048  }
  0x97   :  { %38 = vst.msk [vmem:[#allocation2] sm:$0xff] %vm37_vm9, %v35_v11  ;;  %vm249_vm9 = vcmask 1022976  }
  0x99   :  { %v42_v14 = vpop.permute.xlu1 %41 }
  0x9a   :  { %v123_v13 = vpop.permute.xlu0 %122  ;;  %45 = vst.msk [vmem:[#allocation2] sm:$0xff] %vm44_vm12, %v42_v14  ;;  %vm269_vm12 = vcmask 392448  }
  0x9b   :  { %126 = vst.msk [vmem:[#allocation2 + $0x10] sm:$0xff] %vm125_vm11, %v123_v13  ;;  %vm264_vm11 = vcmask 261248  }
  0x9d   :  { %v130_v16 = vpop.permute.xlu1 %129 }
  0x9e   :  { %v100_v15 = vpop.permute.xlu0 %99  ;;  %133 = vst.msk [vmem:[#allocation2 + $0x10] sm:$0xff] %vm132_vm14, %v130_v16  ;;  %vm325_vm14 = vcmask 728064  }
  0x9f   :  { %103 = vst.msk [vmem:[#allocation2 + $0x8] sm:$0xff] %vm102_vm13, %v100_v15  ;;  %vm274_vm13 = vcmask 523648  }
  0xa0   :  { %110 = vst.msk [vmem:[#allocation2 + $0x8] sm:$0xff] %vm109_vm15, %v107_v7  ;;  %vm283_vm15 = vcmask 786048  }
  0xa1   :  { %v137_v18 = vpop.permute.xlu1 %136 }
  0xa2   :  { %v49_v17 = vpop.permute.xlu0 %48  ;;  %140 = vst.msk [vmem:[#allocation2 + $0x10] sm:$0xff] %vm139_vm1, %v137_v18  ;;  %vm290_vm1 = vcmask 900096  }
  0xa3   :  { %52 = vst.msk [vmem:[#allocation2] sm:$0xff] %vm51_vm0, %v49_v17  ;;  %vm293_vm0 = vcmask 917248  }
  0xa4   :  { %59 = vst.msk [vmem:[#allocation2] sm:$0xff] %vm58_vm2, %v56_v4  ;;  %vm298_vm2 = vcmask 1048448  }
  0xa7   :  { %v142_v23 = vld [vmem:[#allocation2 + $0x8] sm:$0xff] }
  0xa8   :  { %v148_v24 = vmul.f32 0.375, %v142_v23  ;;  %v145_v26 = vmul.f32 0.125, %v142_v23 }
  0xa9   :  { %v143_v19 = vld [vmem:[#allocation2 + $0x10] sm:$0xff] }
  0xaa   :  { %v149_v20 = vmul.f32 0.375, %v143_v19  ;;  %v146_v25 = vmul.f32 0.125, %v143_v19 }
  0xab   :  { %v141_v21 = vld [vmem:[#allocation2] sm:$0xff] }
  0xac   :  { %v147_v22 = vmul.f32 0.375, %v141_v21  ;;  %157 = vrot.lane.b32.xlu1 %v149_v20, %s457_s4  ;;  %v144_v27 = vmul.f32 0.125, %v141_v21 }
  0xae   :  { %153 = vrot.lane.b32.xlu0 %v147_v22, %s457_s4 }
  0xb0   :  { %168 = vrot.lane.b32.xlu1 %v147_v22, %s458_s5 }
  0xb2   :  { %172 = vrot.lane.b32.xlu0 %v149_v20, %s458_s5 }
  0xb4   :  { %170 = vrot.lane.b32.xlu1 %v148_v24, %s458_s5 }
  0xb6   :  { %155 = vrot.lane.b32.xlu0 %v148_v24, %s457_s4 }
  0xb8   :  { %190 = vrot.lane.b32.xlu1 %v146_v25, %s459_s6 }
  0xba   :  { %188 = vrot.lane.b32.xlu0 %v145_v26, %s459_s6 }
  0xbe   :  { %186 = vrot.lane.b32.xlu0 %v144_v27, %s459_s6 }
 0x11e   :  { %v158_v28 = vpop.permute.xlu1 %157 }
 0x11f   :  { %v167_v33 = vadd.f32 %v158_v28, %v146_v25 }
 0x120   :  { %v154_v29 = vpop.permute.xlu0 %153 }
 0x122   :  { %v169_v30 = vpop.permute.xlu1 %168 }
 0x124   :  { %v173_v31 = vpop.permute.xlu0 %172 }
 0x125   :  { %v182_v37 = vadd.f32 %v173_v31, %v167_v33 }
 0x126   :  { %v171_v32 = vpop.permute.xlu1 %170 }
 0x127   :  { %v176_v39 = vsel %vm174_vm4, %v171_v32, %v173_v31  ;;  %v175_v48 = vsel %vm174_vm4, %v169_v30, %v171_v32 }
 0x128   :  { %v156_v34 = vpop.permute.xlu0 %155 }
 0x129   :  { %v160_v35 = vsel %vm159_vm3, %v154_v29, %v156_v34  ;;  %v161_v36 = vsel %vm159_vm3, %v156_v34, %v158_v28 }
 0x12a   :  { %v166_v38 = vadd.f32 %v161_v36, %v145_v26  ;;  %v191_v40 = vpop.permute.xlu1 %190  ;;  %v165_v41 = vadd.f32 %v160_v35, %v144_v27 }
 0x12b   :  { %v200_v42 = vadd.f32 %v191_v40, %v182_v37 }
 0x12c   :  { %v181_v43 = vadd.f32 %v176_v39, %v166_v38  ;;  %v189_v44 = vpop.permute.xlu0 %188  ;;  %v180_v50 = vadd.f32 %v175_v48, %v165_v41 }
 0x12d   :  { %v194_v45 = vsel %vm192_vm5, %v189_v44, %v191_v40  ;;  %v206_v46 = vmul.f32 0.375, %v200_v42  ;;  %v203_v55 = vmul.f32 0.125, %v200_v42 }
 0x12e   :  { %v199_v47 = vadd.f32 %v194_v45, %v181_v43 }
 0x12f   :  { %229 = vrot.lane.b32.xlu1 %v206_v46, %s460_s7  ;;  %214 = vrot.lane.b32.xlu0 %v206_v46, %s461_s8 }
 0x130   :  { %v187_v49 = vpop.permute.xlu0 %186  ;;  %v205_v53 = vmul.f32 0.375, %v199_v47  ;;  %v202_v56 = vmul.f32 0.125, %v199_v47 }
 0x131   :  { %v193_v51 = vsel %vm192_vm5, %v187_v49, %v189_v44 }
 0x132   :  { %v198_v52 = vadd.f32 %v193_v51, %v180_v50 }
 0x133   :  { %212 = vrot.lane.b32.xlu1 %v205_v53, %s461_s8  ;;  %227 = vrot.lane.b32.xlu0 %v205_v53, %s460_s7 }
 0x134   :  { %v204_v54 = vmul.f32 0.375, %v198_v52  ;;  %v201_v57 = vmul.f32 0.125, %v198_v52 }
 0x137   :  { %225 = vrot.lane.b32.xlu0 %v204_v54, %s460_s7  ;;  %210 = vrot.lane.b32.xlu1 %v204_v54, %s461_s8 }
 0x13b   :  { %247 = vrot.lane.b32.xlu0 %v203_v55, %s462_s9  ;;  %245 = vrot.lane.b32.xlu1 %v202_v56, %s462_s9 }
 0x13f   :  { %243 = vrot.lane.b32.xlu1 %v201_v57, %s462_s9 }
 0x1a1   :  { %v230_v58 = vpop.permute.xlu1 %229  ;;  %v215_v59 = vpop.permute.xlu0 %214 }
 0x1a2   :  { %v224_v62 = vadd.f32 %v215_v59, %v203_v55 }
 0x1a4   :  { %v239_v2 = vadd.f32 %v230_v58, %v224_v62 }
 0x1a5   :  { %v213_v60 = vpop.permute.xlu1 %212  ;;  %v228_v61 = vpop.permute.xlu0 %227 }
 0x1a6   :  { %v218_v3 = vsel %vm216_vm6, %v213_v60, %v215_v59  ;;  %v233_v13 = vsel %vm231_vm8, %v228_v61, %v230_v58 }
 0x1a7   :  { %v223_v8 = vadd.f32 %v218_v3, %v202_v56 }
 0x1a9   :  { %v226_v63 = vpop.permute.xlu0 %225  ;;  %v211_v0 = vpop.permute.xlu1 %210  ;;  %v238_v16 = vadd.f32 %v233_v13, %v223_v8 }
 0x1aa   :  { %v217_v1 = vsel %vm216_vm6, %v211_v0, %v213_v60  ;;  %v232_v9 = vsel %vm231_vm8, %v226_v63, %v228_v61 }
 0x1ab   :  { %v222_v4 = vadd.f32 %v217_v1, %v201_v57 }
 0x1ad   :  { %v248_v5 = vpop.permute.xlu0 %247  ;;  %v246_v6 = vpop.permute.xlu1 %245  ;;  %v237_v11 = vadd.f32 %v232_v9, %v222_v4 }
 0x1ae   :  { %v257_v7 = vadd.f32 %v248_v5, %v239_v2  ;;  %v251_v14 = vsel %vm249_vm9, %v246_v6, %v248_v5 }
 0x1af   :  { %v256_v17 = vadd.f32 %v251_v14, %v238_v16 }
 0x1b0   :  { %323 = vrot.lane.b32.xlu0 %v257_v7, %s463_s10 }
 0x1b1   :  { %v244_v10 = vpop.permute.xlu1 %243 }
 0x1b2   :  { %v250_v12 = vsel %vm249_vm9, %v244_v10, %v246_v6 }
 0x1b3   :  { %v255_v15 = vadd.f32 %v250_v12, %v237_v11 }
 0x1b4   :  { %329 = vrot.lane.b32.xlu0 %v257_v7, %s464_s11 }
 0x1b5   :  { %261 = vrot.lane.b32.xlu1 %v255_v15, %s462_s9  ;;  %259 = vst.msk [vmem:[#allocation6] sm:$0xff] %vm258_vm10, %v255_v15 }
 0x1b8   :  { %300 = vrot.lane.b32.xlu0 %v256_v17, %s465_s12 }
 0x1b9   :  { %266 = vrot.lane.b32.xlu1 %v255_v15, %s466_s13 }
 0x1bc   :  { %304 = vrot.lane.b32.xlu0 %v256_v17, %s467_s14 }
 0x1bd   :  { %271 = vrot.lane.b32.xlu1 %v255_v15, %s468_s15 }
 0x1c0   :  { %308 = vrot.lane.b32.xlu0 %v256_v17, %s469_s16 }
 0x1c1   :  { %276 = vrot.lane.b32.xlu1 %v255_v15, %s470_s17 }
 0x1c4   :  { %312 = vrot.lane.b32.xlu0 %v256_v17, %s471_s18 }
 0x1c5   :  { %321 = vrot.lane.b32.xlu1 %v256_v17, %s463_s10 }
 0x1c8   :  { %316 = vrot.lane.b32.xlu0 %v256_v17, %s472_s19 }
 0x1c9   :  { %280 = vrot.lane.b32.xlu1 %v255_v15, %s473_s20 }
 0x1cc   :  { %286 = vrot.lane.b32.xlu0 %v255_v15, %s474_s21 }
 0x1cd   :  { %288 = vrot.lane.b32.xlu1 %v256_v17, %s474_s21 }
 0x1d0   :  { %333 = vrot.lane.b32.xlu0 %v257_v7, %s475_s22 }
 0x1d1   :  { %295 = vrot.lane.b32.xlu1 %v256_v17, %s476_s0 }
 0x222   :  { %v324_v18 = vpop.permute.xlu0 %323 }
 0x226   :  { %v330_v19 = vpop.permute.xlu0 %329 }
 0x227   :  { %v262_v20 = vpop.permute.xlu1 %261 }
 0x228   :  { %265 = vst.msk [vmem:[#allocation6] sm:$0xff] %vm264_vm11, %v262_v20 }
 0x22a   :  { %v301_v21 = vpop.permute.xlu0 %300 }
 0x22b   :  { %303 = vst.msk [vmem:[#allocation6 + $0x8] sm:$0xff] %vm258_vm10, %v301_v21  ;;  %v267_v22 = vpop.permute.xlu1 %266 }
 0x22c   :  { %270 = vst.msk [vmem:[#allocation6] sm:$0xff] %vm269_vm12, %v267_v22 }
 0x22e   :  { %v305_v23 = vpop.permute.xlu0 %304 }
 0x22f   :  { %307 = vst.msk [vmem:[#allocation6 + $0x8] sm:$0xff] %vm264_vm11, %v305_v23  ;;  %v272_v24 = vpop.permute.xlu1 %271 }
 0x230   :  { %275 = vst.msk [vmem:[#allocation6] sm:$0xff] %vm274_vm13, %v272_v24 }
 0x232   :  { %v309_v25 = vpop.permute.xlu0 %308 }
 0x233   :  { %311 = vst.msk [vmem:[#allocation6 + $0x8] sm:$0xff] %vm269_vm12, %v309_v25  ;;  %v277_v26 = vpop.permute.xlu1 %276 }
 0x234   :  { %279 = vst.msk [vmem:[#allocation6] sm:$0xff] %vm88_vm7, %v277_v26 }
 0x236   :  { %v313_v27 = vpop.permute.xlu0 %312 }
 0x237   :  { %315 = vst.msk [vmem:[#allocation6 + $0x8] sm:$0xff] %vm274_vm13, %v313_v27  ;;  %v322_v28 = vpop.permute.xlu1 %321 }
 0x238   :  { %v326_v30 = vsel %vm325_vm14, %v322_v28, %v324_v18 }
 0x23a   :  { %v317_v29 = vpop.permute.xlu0 %316 }
 0x23b   :  { %319 = vst.msk [vmem:[#allocation6 + $0x8] sm:$0xff] %vm88_vm7, %v317_v29  ;;  %v281_v31 = vpop.permute.xlu1 %280 }
 0x23c   :  { %328 = vst.msk [vmem:[#allocation6 + $0x8] sm:$0xff] %vm283_vm15, %v326_v30  ;;  %284 = vst.msk [vmem:[#allocation6] sm:$0xff] %vm283_vm15, %v281_v31 }
 0x23d   :  { %332 = vst.msk [vmem:[#allocation6 + $0x8] sm:$0xff] %vm293_vm0, %v330_v19 }
 0x23e   :  { %v287_v32 = vpop.permute.xlu0 %286 }
 0x23f   :  { %v289_v33 = vpop.permute.xlu1 %288 }
 0x240   :  { %v291_v34 = vsel %vm290_vm1, %v287_v32, %v289_v33 }
 0x241   :  { %294 = vst.msk [vmem:[#allocation6] sm:$0xff] %vm293_vm0, %v291_v34 }
 0x242   :  { %v334_v35 = vpop.permute.xlu0 %333 }
 0x243   :  { %v296_v36 = vpop.permute.xlu1 %295  ;;  %336 = vst.msk [vmem:[#allocation6 + $0x8] sm:$0xff] %vm298_vm2, %v334_v35 }
 0x244   :  { %299 = vst.msk [vmem:[#allocation6] sm:$0xff] %vm298_vm2, %v296_v36 }
 0x245   :  { %424 = shalt.err (!%p421_p12)
}
 0x246   :  { %s425_s28 = scalar_lea.hbm %s526_s1, 256 }
 0x247   :  { %p426_p13 = scmp.ne.s32.totalorder %s526_s1, %s425_s28  ;;  %p429_p0 = scmp.lt.u32.totalorder %s425_s28, %s526_s1 }
 0x249   :  { %p431_p1 = pnand %p429_p0, %p426_p13 }
 0x24b   :  { %434 = shalt.err (!%p431_p1)
}
 0x24c   :  { %346 = dma.vmem_to_hbm [thread:$0]  %s344_s24, 256, %s526_s1, [#allocation5]  }
 0x24d   :  { %437 = dma.done.wait [#allocation5], 256  }
 0x24e   :  { %438 = vsyncadd [#allocation5], 4294967040 }
 0x24f   :  { %350 = vsyncpa [#allocation4], 1 }
 0x250   :  { %351 = vsyncpa [#allocation5], 1 }

</bundles_post_ra>
